<compile_context>
chip_gen: v6e
topology: v6e:2x2x1
jax: 0.10.0
libtpu: 0.0.40
codegen_flags: <defaults>
</compile_context>

<pallas_src>
import functools

import jax
import jax.numpy as jnp
from jax.experimental import pallas as pl
from jax.experimental.pallas import tpu as pltpu

CP = 128   # lane-dense padded class dim (output written as [Bp, 128], sliced later)


# ----------------------------- Pallas kernel -------------------------------

def ensemble_kernel(ids_ref,    # [S*Bp, 1]   int32  time-major token ids (batch padded)
                    wbig_ref,   # [V, H+K*F]  bf16   embed @ [Wxh | Wconv_0..K-1]
                    whh_ref,    # [H, H]      bf16   RNN hidden->hidden
                    bh_ref,     # [1, H]      f32
                    bconv_ref,  # [1, F]      f32
                    who_ref,    # [H, CP]     bf16   RNN head, lane-padded to 128
                    wfc_ref,    # [F, CP]     bf16   CNN head, lane-padded to 128
                    bhead_ref,  # [1, CP]     f32    bo + bfc, lane-padded
                    out_ref,    # [Bp, CP]    f32    ensemble logits (padded)
                    *, S, Bp, K, H, F, V):
    # ---- fused embedding gather + BOTH x-projections: one MXU matmul ----
    ids = ids_ref[...]                                              # [S*Bp, 1]
    oh = (ids == jax.lax.broadcasted_iota(jnp.int32, (S * Bp, V), 1))
    oh = oh.astype(wbig_ref.dtype)                                  # [S*Bp, V] one-hot
    proj = jnp.dot(oh, wbig_ref[...],
                   preferred_element_type=jnp.float32)              # [S*Bp, H+K*F]

    xh = proj[:, :H].reshape(S, Bp, H)                              # RNN input proj
    conv = proj[:, H:].reshape(S, Bp, K * F)                        # conv taps

    # ---- model1: vanilla tanh-RNN (only h @ Whh stays on the serial path) ----
    whh = whh_ref[...]
    bh = bh_ref[...]
    h = jnp.zeros((Bp, H), jnp.float32)
    for t in range(S):   # S small & static; TODO(synk): switch to lax.fori_loop at large S
        h = jnp.tanh(xh[t] + bh
                     + jnp.dot(h.astype(whh.dtype), whh,
                               preferred_element_type=jnp.float32))

    # ---- model2: TextCNN: 'valid' conv (sum of K time-shifted taps) + ReLU + time max
    NW = S - K + 1
    win = bconv_ref[...]                                            # [1, F], broadcast
    for k in range(K):   # K static lane extractions total (NOT per window)
        win = win + conv[k:k + NW, :, k * F:(k + 1) * F]            # [NW, Bp, F]
    pooled = jnp.max(jnp.maximum(win, 0.0), axis=0)                 # [Bp, F]

    # ---- ensemble head: cat(...,2).sum(2) == add of the two heads (no lane concat) ----
    logits = (jnp.dot(h.astype(who_ref.dtype), who_ref[...],
                      preferred_element_type=jnp.float32)
              + jnp.dot(pooled.astype(wfc_ref.dtype), wfc_ref[...],
                        preferred_element_type=jnp.float32)
              + bhead_ref[...])
    out_ref[...] = logits.astype(out_ref.dtype)


# ----------------------------- one-time weight prep -------------------------

def prepare_params(params):
    """Hoisted out of the per-call hot path: fused projection table + padded heads."""
    embed = params["embed"].astype(jnp.float32)                     # [V, E]
    K = params["wconv"].shape[0]
    C = params["who"].shape[1]
    assert C <= CP
    # Fused projection weight: embedding folded in via matmul associativity.
    w_x = jnp.concatenate(
        [params["wxh"].astype(jnp.float32)]
        + [params["wconv"][k].astype(jnp.float32) for k in range(K)], axis=1)
    w_big = (embed @ w_x).astype(jnp.bfloat16)                      # [V, H+K*F]
    w_ho = jnp.pad(params["who"], ((0, 0), (0, CP - C))).astype(jnp.bfloat16)
    w_fc = jnp.pad(params["wfc"], ((0, 0), (0, CP - C))).astype(jnp.bfloat16)
    b_head = jnp.pad(params["bo"] + params["bfc"],
                     ((0, 0), (0, CP - C))).astype(jnp.float32)     # zero-padded lanes
    return {
        "w_big": w_big,
        "whh": params["whh"].astype(jnp.bfloat16),
        "bh": params["bh"].astype(jnp.float32),
        "bconv": params["bconv"].astype(jnp.float32),
        "w_ho": w_ho,
        "w_fc": w_fc,
        "b_head": b_head,
    }


# ----------------------------- forward wrapper ------------------------------

@functools.partial(jax.jit, static_argnames=("num_classes",))
def ensemble_forward(x_tokens, y, prep, *, num_classes):
    """x_tokens: int32 [B, S] token ids.  y: labels (unused by forward)."""
    del y  # labels are only consumed by the loss in the original models
    B, S = x_tokens.shape
    V, P = prep["w_big"].shape
    H = prep["whh"].shape[0]
    F = prep["bconv"].shape[1]
    K = (P - H) // F
    assert S >= K, "sequence must be at least as long as the conv kernel"

    Bp = max(8, ((B + 7) // 8) * 8)                                 # sublane-pad batch
    ids = jnp.pad(x_tokens.T.astype(jnp.int32), ((0, 0), (0, Bp - B)))
    ids = ids.reshape(S * Bp, 1)                                    # time-major rows

    kernel = functools.partial(ensemble_kernel, S=S, Bp=Bp, K=K, H=H, F=F, V=V)
    full = lambda shape: pl.BlockSpec(shape, lambda i: (0,) * len(shape))

    out = pl.pallas_call(
        kernel,
        out_shape=jax.ShapeDtypeStruct((Bp, CP), jnp.float32),
        grid=(1,),
        in_specs=[
            full((S * Bp, 1)),     # ids
            full((V, P)),          # w_big
            full((H, H)),          # whh
            full((1, H)),          # bh
            full((1, F)),          # bconv
            full((H, CP)),         # w_ho
            full((F, CP)),         # w_fc
            full((1, CP)),         # b_head
        ],
        out_specs=full((Bp, CP)),
        compiler_params=pltpu.CompilerParams(
            dimension_semantics=("arbitrary",)),
        # TODO(synk): at larger B, add a parallel batch grid axis (blocked specs,
        #             vmem_limit_bytes, Buffered(1) weights) to use both v7x cores.
    )(ids, prep["w_big"], prep["whh"], prep["bh"], prep["bconv"],
      prep["w_ho"], prep["w_fc"], prep["b_head"])

    return out[:B, :num_classes]                                    # [B, C]


# ----------------------------- param init ----------------------------------

def init_params(key, vocab=50, embed=32, hidden=32, filters=32, ksize=3, classes=4):
    ks = jax.random.split(key, 8)

    def s(k, shape, scale, dtype=jnp.bfloat16):
        return (scale * jax.random.normal(k, shape)).astype(dtype)

    return {
        "embed": s(ks[0], (vocab, embed), 0.1),
        "wxh":   s(ks[1], (embed, hidden), 0.1),
        "whh":   s(ks[2], (hidden, hidden), 0.1),
        "bh":    jnp.zeros((1, hidden), jnp.float32),
        "who":   s(ks[3], (hidden, classes), 0.1, jnp.float32),
        "bo":    jnp.zeros((1, classes), jnp.float32),
        "wconv": s(ks[4], (ksize, embed, filters), 0.1),
        "bconv": jnp.zeros((1, filters), jnp.float32),
        "wfc":   s(ks[5], (filters, classes), 0.1, jnp.float32),
        "bfc":   jnp.zeros((1, classes), jnp.float32),
    }


if __name__ == "__main__":
    key = jax.random.PRNGKey(0)
    B, S, VOCAB, CLASSES = 2, 8, 50, 4

    params = init_params(key, vocab=VOCAB, classes=CLASSES)
    prep = prepare_params(params)            # one-time weight preprocessing

    kx, ky = jax.random.split(jax.random.PRNGKey(1))
    x_tokens = jax.random.randint(kx, (B, S), 0, VOCAB, dtype=jnp.int32)
    y_labels = jax.random.randint(ky, (B,), 0, CLASSES, dtype=jnp.int32)

    logits = ensemble_forward(x_tokens, y_labels, prep, num_classes=CLASSES)
    jax.block_until_ready(logits)
    assert logits.shape == (B, CLASSES), logits.shape
    assert bool(jnp.all(jnp.isfinite(logits)))
    print("KERNEL_OK")
</pallas_src>

<mosaic_0001>
module attributes {stable_mosaic.version = 11 : i64} {
  func.func @ensemble_kernel(%arg0: i32, %arg1: memref<64x1xi32, #tpu.memory_space<vmem>>, %arg2: memref<50x128xbf16, #tpu.memory_space<vmem>>, %arg3: memref<32x32xbf16, #tpu.memory_space<vmem>>, %arg4: memref<1x32xf32, #tpu.memory_space<vmem>>, %arg5: memref<1x32xf32, #tpu.memory_space<vmem>>, %arg6: memref<32x128xbf16, #tpu.memory_space<vmem>>, %arg7: memref<32x128xbf16, #tpu.memory_space<vmem>>, %arg8: memref<1x128xf32, #tpu.memory_space<vmem>>, %arg9: memref<8x128xf32, #tpu.memory_space<vmem>>) attributes {dimension_semantics = [#tpu.dimension_semantics<arbitrary>], iteration_bounds = array<i64: 1>, scalar_prefetch = 0 : i64, scratch_operands = 0 : i64, tpu.core_type = #tpu.core_type<tc>, window_params = [{pipeline_mode = #tpu.pipeline_mode<synchronous>, transform_indices = @transform_0, window_bounds = array<i64: 64, 1>}, {pipeline_mode = #tpu.pipeline_mode<synchronous>, transform_indices = @transform_1, window_bounds = array<i64: 50, 128>}, {pipeline_mode = #tpu.pipeline_mode<synchronous>, transform_indices = @transform_2, window_bounds = array<i64: 32, 32>}, {pipeline_mode = #tpu.pipeline_mode<synchronous>, transform_indices = @transform_3, window_bounds = array<i64: 1, 32>}, {pipeline_mode = #tpu.pipeline_mode<synchronous>, transform_indices = @transform_4, window_bounds = array<i64: 1, 32>}, {pipeline_mode = #tpu.pipeline_mode<synchronous>, transform_indices = @transform_5, window_bounds = array<i64: 32, 128>}, {pipeline_mode = #tpu.pipeline_mode<synchronous>, transform_indices = @transform_6, window_bounds = array<i64: 32, 128>}, {pipeline_mode = #tpu.pipeline_mode<synchronous>, transform_indices = @transform_7, window_bounds = array<i64: 1, 128>}, {pipeline_mode = #tpu.pipeline_mode<synchronous>, transform_indices = @transform_8, window_bounds = array<i64: 8, 128>}]} {
    %c0 = arith.constant 0 : index
    %c0_0 = arith.constant 0 : index
    %0 = vector.load %arg1[%c0, %c0_0] : memref<64x1xi32, #tpu.memory_space<vmem>>, vector<64x1xi32>
    %1 = tpu.iota {dimensions = array<i32: 1>} : vector<64x50xi32>
    %2 = vector.broadcast %0 : vector<64x1xi32> to vector<64x50xi32>
    %3 = arith.cmpi eq, %2, %1 : vector<64x50xi32>
    %4 = arith.extui %3 : vector<64x50xi1> to vector<64x50xi32>
    %5 = arith.sitofp %4 : vector<64x50xi32> to vector<64x50xf32>
    %6 = arith.truncf %5 : vector<64x50xf32> to vector<64x50xbf16>
    %c0_1 = arith.constant 0 : index
    %c0_2 = arith.constant 0 : index
    %7 = vector.load %arg2[%c0_1, %c0_2] : memref<50x128xbf16, #tpu.memory_space<vmem>>, vector<50x128xbf16>
    %cst = arith.constant dense<0.000000e+00> : vector<64x128xf32>
    %8 = tpu.matmul %6, %7, %cst {dimension_numbers = #tpu.dot_dimension_numbers<[1], [0], [0], [1], [0, 0, 1, 1], [], []>} : vector<64x50xbf16>, vector<50x128xbf16>, vector<64x128xf32> -> vector<64x128xf32>
    %9 = vector.extract_strided_slice %8 {offsets = [0, 0], sizes = [64, 32], strides = [1, 1]} : vector<64x128xf32> to vector<64x32xf32>
    %10 = vector.shape_cast %9 : vector<64x32xf32> to vector<8x8x32xf32>
    %11 = vector.extract_strided_slice %8 {offsets = [0, 32], sizes = [64, 96], strides = [1, 1]} : vector<64x128xf32> to vector<64x96xf32>
    %12 = vector.shape_cast %11 : vector<64x96xf32> to vector<8x8x96xf32>
    %c0_3 = arith.constant 0 : index
    %c0_4 = arith.constant 0 : index
    %13 = vector.load %arg3[%c0_3, %c0_4] : memref<32x32xbf16, #tpu.memory_space<vmem>>, vector<32x32xbf16>
    %c0_5 = arith.constant 0 : index
    %c0_6 = arith.constant 0 : index
    %14 = vector.load %arg4[%c0_5, %c0_6] : memref<1x32xf32, #tpu.memory_space<vmem>>, vector<1x32xf32>
    %cst_7 = arith.constant 0.000000e+00 : f32
    %15 = vector.broadcast %cst_7 : f32 to vector<8x32xf32>
    %16 = vector.extract_strided_slice %10 {offsets = [0, 0, 0], sizes = [1, 8, 32], strides = [1, 1, 1]} : vector<8x8x32xf32> to vector<1x8x32xf32>
    %17 = vector.shape_cast %16 : vector<1x8x32xf32> to vector<8x32xf32>
    %18 = vector.broadcast %14 : vector<1x32xf32> to vector<8x32xf32>
    %19 = arith.addf %17, %18 : vector<8x32xf32>
    %20 = arith.truncf %15 : vector<8x32xf32> to vector<8x32xbf16>
    %cst_8 = arith.constant dense<0.000000e+00> : vector<8x32xf32>
    %21 = tpu.matmul %20, %13, %cst_8 {dimension_numbers = #tpu.dot_dimension_numbers<[1], [0], [0], [1], [0, 0, 1, 1], [], []>} : vector<8x32xbf16>, vector<32x32xbf16>, vector<8x32xf32> -> vector<8x32xf32>
    %22 = arith.addf %19, %21 : vector<8x32xf32>
    %23 = math.tanh %22 : vector<8x32xf32>
    %24 = vector.extract_strided_slice %10 {offsets = [1, 0, 0], sizes = [1, 8, 32], strides = [1, 1, 1]} : vector<8x8x32xf32> to vector<1x8x32xf32>
    %25 = vector.shape_cast %24 : vector<1x8x32xf32> to vector<8x32xf32>
    %26 = vector.broadcast %14 : vector<1x32xf32> to vector<8x32xf32>
    %27 = arith.addf %25, %26 : vector<8x32xf32>
    %28 = arith.truncf %23 : vector<8x32xf32> to vector<8x32xbf16>
    %cst_9 = arith.constant dense<0.000000e+00> : vector<8x32xf32>
    %29 = tpu.matmul %28, %13, %cst_9 {dimension_numbers = #tpu.dot_dimension_numbers<[1], [0], [0], [1], [0, 0, 1, 1], [], []>} : vector<8x32xbf16>, vector<32x32xbf16>, vector<8x32xf32> -> vector<8x32xf32>
    %30 = arith.addf %27, %29 : vector<8x32xf32>
    %31 = math.tanh %30 : vector<8x32xf32>
    %32 = vector.extract_strided_slice %10 {offsets = [2, 0, 0], sizes = [1, 8, 32], strides = [1, 1, 1]} : vector<8x8x32xf32> to vector<1x8x32xf32>
    %33 = vector.shape_cast %32 : vector<1x8x32xf32> to vector<8x32xf32>
    %34 = vector.broadcast %14 : vector<1x32xf32> to vector<8x32xf32>
    %35 = arith.addf %33, %34 : vector<8x32xf32>
    %36 = arith.truncf %31 : vector<8x32xf32> to vector<8x32xbf16>
    %cst_10 = arith.constant dense<0.000000e+00> : vector<8x32xf32>
    %37 = tpu.matmul %36, %13, %cst_10 {dimension_numbers = #tpu.dot_dimension_numbers<[1], [0], [0], [1], [0, 0, 1, 1], [], []>} : vector<8x32xbf16>, vector<32x32xbf16>, vector<8x32xf32> -> vector<8x32xf32>
    %38 = arith.addf %35, %37 : vector<8x32xf32>
    %39 = math.tanh %38 : vector<8x32xf32>
    %40 = vector.extract_strided_slice %10 {offsets = [3, 0, 0], sizes = [1, 8, 32], strides = [1, 1, 1]} : vector<8x8x32xf32> to vector<1x8x32xf32>
    %41 = vector.shape_cast %40 : vector<1x8x32xf32> to vector<8x32xf32>
    %42 = vector.broadcast %14 : vector<1x32xf32> to vector<8x32xf32>
    %43 = arith.addf %41, %42 : vector<8x32xf32>
    %44 = arith.truncf %39 : vector<8x32xf32> to vector<8x32xbf16>
    %cst_11 = arith.constant dense<0.000000e+00> : vector<8x32xf32>
    %45 = tpu.matmul %44, %13, %cst_11 {dimension_numbers = #tpu.dot_dimension_numbers<[1], [0], [0], [1], [0, 0, 1, 1], [], []>} : vector<8x32xbf16>, vector<32x32xbf16>, vector<8x32xf32> -> vector<8x32xf32>
    %46 = arith.addf %43, %45 : vector<8x32xf32>
    %47 = math.tanh %46 : vector<8x32xf32>
    %48 = vector.extract_strided_slice %10 {offsets = [4, 0, 0], sizes = [1, 8, 32], strides = [1, 1, 1]} : vector<8x8x32xf32> to vector<1x8x32xf32>
    %49 = vector.shape_cast %48 : vector<1x8x32xf32> to vector<8x32xf32>
    %50 = vector.broadcast %14 : vector<1x32xf32> to vector<8x32xf32>
    %51 = arith.addf %49, %50 : vector<8x32xf32>
    %52 = arith.truncf %47 : vector<8x32xf32> to vector<8x32xbf16>
    %cst_12 = arith.constant dense<0.000000e+00> : vector<8x32xf32>
    %53 = tpu.matmul %52, %13, %cst_12 {dimension_numbers = #tpu.dot_dimension_numbers<[1], [0], [0], [1], [0, 0, 1, 1], [], []>} : vector<8x32xbf16>, vector<32x32xbf16>, vector<8x32xf32> -> vector<8x32xf32>
    %54 = arith.addf %51, %53 : vector<8x32xf32>
    %55 = math.tanh %54 : vector<8x32xf32>
    %56 = vector.extract_strided_slice %10 {offsets = [5, 0, 0], sizes = [1, 8, 32], strides = [1, 1, 1]} : vector<8x8x32xf32> to vector<1x8x32xf32>
    %57 = vector.shape_cast %56 : vector<1x8x32xf32> to vector<8x32xf32>
    %58 = vector.broadcast %14 : vector<1x32xf32> to vector<8x32xf32>
    %59 = arith.addf %57, %58 : vector<8x32xf32>
    %60 = arith.truncf %55 : vector<8x32xf32> to vector<8x32xbf16>
    %cst_13 = arith.constant dense<0.000000e+00> : vector<8x32xf32>
    %61 = tpu.matmul %60, %13, %cst_13 {dimension_numbers = #tpu.dot_dimension_numbers<[1], [0], [0], [1], [0, 0, 1, 1], [], []>} : vector<8x32xbf16>, vector<32x32xbf16>, vector<8x32xf32> -> vector<8x32xf32>
    %62 = arith.addf %59, %61 : vector<8x32xf32>
    %63 = math.tanh %62 : vector<8x32xf32>
    %64 = vector.extract_strided_slice %10 {offsets = [6, 0, 0], sizes = [1, 8, 32], strides = [1, 1, 1]} : vector<8x8x32xf32> to vector<1x8x32xf32>
    %65 = vector.shape_cast %64 : vector<1x8x32xf32> to vector<8x32xf32>
    %66 = vector.broadcast %14 : vector<1x32xf32> to vector<8x32xf32>
    %67 = arith.addf %65, %66 : vector<8x32xf32>
    %68 = arith.truncf %63 : vector<8x32xf32> to vector<8x32xbf16>
    %cst_14 = arith.constant dense<0.000000e+00> : vector<8x32xf32>
    %69 = tpu.matmul %68, %13, %cst_14 {dimension_numbers = #tpu.dot_dimension_numbers<[1], [0], [0], [1], [0, 0, 1, 1], [], []>} : vector<8x32xbf16>, vector<32x32xbf16>, vector<8x32xf32> -> vector<8x32xf32>
    %70 = arith.addf %67, %69 : vector<8x32xf32>
    %71 = math.tanh %70 : vector<8x32xf32>
    %72 = vector.extract_strided_slice %10 {offsets = [7, 0, 0], sizes = [1, 8, 32], strides = [1, 1, 1]} : vector<8x8x32xf32> to vector<1x8x32xf32>
    %73 = vector.shape_cast %72 : vector<1x8x32xf32> to vector<8x32xf32>
    %74 = vector.broadcast %14 : vector<1x32xf32> to vector<8x32xf32>
    %75 = arith.addf %73, %74 : vector<8x32xf32>
    %76 = arith.truncf %71 : vector<8x32xf32> to vector<8x32xbf16>
    %cst_15 = arith.constant dense<0.000000e+00> : vector<8x32xf32>
    %77 = tpu.matmul %76, %13, %cst_15 {dimension_numbers = #tpu.dot_dimension_numbers<[1], [0], [0], [1], [0, 0, 1, 1], [], []>} : vector<8x32xbf16>, vector<32x32xbf16>, vector<8x32xf32> -> vector<8x32xf32>
    %78 = arith.addf %75, %77 : vector<8x32xf32>
    %79 = math.tanh %78 : vector<8x32xf32>
    %c0_16 = arith.constant 0 : index
    %c0_17 = arith.constant 0 : index
    %80 = vector.load %arg5[%c0_16, %c0_17] : memref<1x32xf32, #tpu.memory_space<vmem>>, vector<1x32xf32>
    %81 = vector.extract_strided_slice %12 {offsets = [0, 0, 0], sizes = [6, 8, 32], strides = [1, 1, 1]} : vector<8x8x96xf32> to vector<6x8x32xf32>
    %82 = vector.shape_cast %80 : vector<1x32xf32> to vector<1x1x32xf32>
    %83 = vector.broadcast %82 : vector<1x1x32xf32> to vector<6x8x32xf32>
    %84 = arith.addf %83, %81 : vector<6x8x32xf32>
    %85 = vector.extract_strided_slice %12 {offsets = [1, 0, 32], sizes = [6, 8, 32], strides = [1, 1, 1]} : vector<8x8x96xf32> to vector<6x8x32xf32>
    %86 = arith.addf %84, %85 : vector<6x8x32xf32>
    %87 = vector.extract_strided_slice %12 {offsets = [2, 0, 64], sizes = [6, 8, 32], strides = [1, 1, 1]} : vector<8x8x96xf32> to vector<6x8x32xf32>
    %88 = arith.addf %86, %87 : vector<6x8x32xf32>
    %cst_18 = arith.constant 0.000000e+00 : f32
    %89 = vector.broadcast %cst_18 : f32 to vector<6x8x32xf32>
    %90 = arith.maximumf %88, %89 : vector<6x8x32xf32>
    %cst_19 = arith.constant dense<0xFF800000> : vector<8x32xf32>
    %91 = vector.multi_reduction <maximumf>, %90, %cst_19 [0] : vector<6x8x32xf32> to vector<8x32xf32>
    %92 = arith.truncf %79 : vector<8x32xf32> to vector<8x32xbf16>
    %c0_20 = arith.constant 0 : index
    %c0_21 = arith.constant 0 : index
    %93 = vector.load %arg6[%c0_20, %c0_21] : memref<32x128xbf16, #tpu.memory_space<vmem>>, vector<32x128xbf16>
    %cst_22 = arith.constant dense<0.000000e+00> : vector<8x128xf32>
    %94 = tpu.matmul %92, %93, %cst_22 {dimension_numbers = #tpu.dot_dimension_numbers<[1], [0], [0], [1], [0, 0, 1, 1], [], []>} : vector<8x32xbf16>, vector<32x128xbf16>, vector<8x128xf32> -> vector<8x128xf32>
    %95 = arith.truncf %91 : vector<8x32xf32> to vector<8x32xbf16>
    %c0_23 = arith.constant 0 : index
    %c0_24 = arith.constant 0 : index
    %96 = vector.load %arg7[%c0_23, %c0_24] : memref<32x128xbf16, #tpu.memory_space<vmem>>, vector<32x128xbf16>
    %cst_25 = arith.constant dense<0.000000e+00> : vector<8x128xf32>
    %97 = tpu.matmul %95, %96, %cst_25 {dimension_numbers = #tpu.dot_dimension_numbers<[1], [0], [0], [1], [0, 0, 1, 1], [], []>} : vector<8x32xbf16>, vector<32x128xbf16>, vector<8x128xf32> -> vector<8x128xf32>
    %98 = arith.addf %94, %97 : vector<8x128xf32>
    %c0_26 = arith.constant 0 : index
    %c0_27 = arith.constant 0 : index
    %99 = vector.load %arg8[%c0_26, %c0_27] : memref<1x128xf32, #tpu.memory_space<vmem>>, vector<1x128xf32>
    %100 = vector.broadcast %99 : vector<1x128xf32> to vector<8x128xf32>
    %101 = arith.addf %98, %100 : vector<8x128xf32>
    %c0_28 = arith.constant 0 : index
    %c0_29 = arith.constant 0 : index
    %102 = vector.load %arg9[%c0_28, %c0_29] : memref<8x128xf32, #tpu.memory_space<vmem>>, vector<8x128xf32>
    tpu.vector_store %arg9[%c0_28, %c0_29], %101 {strides = array<i32>} : memref<8x128xf32, #tpu.memory_space<vmem>>, vector<8x128xf32>,
    return
  }
  func.func @transform_0(%arg0: i32) -> (i32, i32) {
    %c0_i32 = arith.constant 0 : i32
    %c0_i32_0 = arith.constant 0 : i32
    %c0_i32_1 = arith.constant 0 : i32
    return %c0_i32, %c0_i32_0 : i32, i32
  }
  func.func @transform_1(%arg0: i32) -> (i32, i32) {
    %c0_i32 = arith.constant 0 : i32
    %c0_i32_0 = arith.constant 0 : i32
    %c0_i32_1 = arith.constant 0 : i32
    return %c0_i32, %c0_i32_0 : i32, i32
  }
  func.func @transform_2(%arg0: i32) -> (i32, i32) {
    %c0_i32 = arith.constant 0 : i32
    %c0_i32_0 = arith.constant 0 : i32
    %c0_i32_1 = arith.constant 0 : i32
    return %c0_i32, %c0_i32_0 : i32, i32
  }
  func.func @transform_3(%arg0: i32) -> (i32, i32) {
    %c0_i32 = arith.constant 0 : i32
    %c0_i32_0 = arith.constant 0 : i32
    %c0_i32_1 = arith.constant 0 : i32
    return %c0_i32, %c0_i32_0 : i32, i32
  }
  func.func @transform_4(%arg0: i32) -> (i32, i32) {
    %c0_i32 = arith.constant 0 : i32
    %c0_i32_0 = arith.constant 0 : i32
    %c0_i32_1 = arith.constant 0 : i32
    return %c0_i32, %c0_i32_0 : i32, i32
  }
  func.func @transform_5(%arg0: i32) -> (i32, i32) {
    %c0_i32 = arith.constant 0 : i32
    %c0_i32_0 = arith.constant 0 : i32
    %c0_i32_1 = arith.constant 0 : i32
    return %c0_i32, %c0_i32_0 : i32, i32
  }
  func.func @transform_6(%arg0: i32) -> (i32, i32) {
    %c0_i32 = arith.constant 0 : i32
    %c0_i32_0 = arith.constant 0 : i32
    %c0_i32_1 = arith.constant 0 : i32
    return %c0_i32, %c0_i32_0 : i32, i32
  }
  func.func @transform_7(%arg0: i32) -> (i32, i32) {
    %c0_i32 = arith.constant 0 : i32
    %c0_i32_0 = arith.constant 0 : i32
    %c0_i32_1 = arith.constant 0 : i32
    return %c0_i32, %c0_i32_0 : i32, i32
  }
  func.func @transform_8(%arg0: i32) -> (i32, i32) {
    %c0_i32 = arith.constant 0 : i32
    %c0_i32_0 = arith.constant 0 : i32
    %c0_i32_1 = arith.constant 0 : i32
    return %c0_i32, %c0_i32_0 : i32, i32
  }
}

</mosaic_0001>

<bundles_post_ra>
// kernel: ensemble_forward.1
= control target key start
LH: loop header
LB: loop body
LE: loop exit
PB: predicated region body
PF: predicated region fallthrough
CT: control target
= control target key end

     0   :  { %v1041_v0 = vmov 0   ;;  %vm133_vm0 = vcmask 1040384   ;;  %v1042_v5 = vmov 0.0   ;;  %vm1043_vm1 = vmmov 0   ;;  %s1044_s10 = smov 64   ;;  %s1045_s11 = smov 96   ;;  %s1291_s0 = inlined_call_operand.vmem [shape: s32[64,1], index: 0, kind: input, shape index: {}]   ;;  %s1292_s1 = inlined_call_operand.vmem [shape: bf16[50,128], index: 1, kind: input, shape index: {}]   ;;  %s1293_s2 = inlined_call_operand.vmem [shape: bf16[32,32], index: 2, kind: input, shape index: {}]   ;;  %s1294_s3 = inlined_call_operand.vmem [shape: f32[1,32], index: 3, kind: input, shape index: {}]   ;;  %s1295_s6 = inlined_call_operand.vmem [shape: bf16[32,128], index: 6, kind: input, shape index: {}]   ;;  %s1296_s4 = inlined_call_operand.vmem [shape: f32[1,32], index: 4, kind: input, shape index: {}]   ;;  %s1297_s5 = inlined_call_operand.vmem [shape: bf16[32,128], index: 5, kind: input, shape index: {}]   ;;  %s1298_s7 = inlined_call_operand.vmem [shape: f32[1,128], index: 7, kind: input, shape index: {}]   ;;  %s1299_s8 = inlined_call_operand.vmem [shape: f32[8,128], index: 8, kind: output, shape index: {}]  }
   0x1   :  { %1014 = vset.pattern.permute.xlu1 %v1041_v0  ;;  %1013 = vset.pattern.permute.xlu0 %v1041_v0  ;;  %v32_v1 = vld [vmem:[%s1291_s0 + $0x10] sm:$0xff]  ;;  %v30_v2 = vld [vmem:[%s1291_s0] sm:$0xff]  ;;  %v33_v3 = vld [vmem:[%s1291_s0 + $0x18] sm:$0xff]  ;;  %v38_v17 = vlaneseq  ;;  %vm120_vm6 = vcmask 408576   ;;  %s1046_s12 = smov 32   ;;  %vm226_vm11 = vcmask 261120  }
   0x2   :  { %47 = vperm.xlu1 %1014, %v32_v1   ;;  %41 = vperm.xlu0 %1013, %v30_v2   ;;  %v31_v4 = vld [vmem:[%s1291_s0 + $0x8] sm:$0xff]  ;;  %v1015_v6 = vld [vmem:[%s1292_s1 + $0x18] ss:$0 sps:$4 sm:$0x11]   ;;  %v1016_v7 = vld [vmem:[%s1292_s1 + $0x10] sm:$0xff]  }
   0x3   :  { %926 = vmatprep.subr.bf16.mxu1 %v1042_v5  ;;  %930 = vmatprep.mubr.msk.bf16.mxu1 %vm1043_vm1, %v1042_v5  ;;  %v35_v8 = vld [vmem:[%s1291_s0 + $0x28] sm:$0xff]  ;;  %v135_v9 = vsel %vm133_vm0, %v1015_v6, 0  ;;  %v34_v11 = vld [vmem:[%s1291_s0 + $0x20] sm:$0xff]  ;;  %v37_v14 = vld [vmem:[%s1291_s0 + $0x38] sm:$0xff]  ;;  %v39_v18 = vand.u32 127, %v38_v17 }
   0x4   :  { %v1119_v10 = vld [vmem:[%s1293_s2 + $0x8] sm:$0xff]   ;;  %1006 = vmatprep.subr.msk.bf16.mxu0 %vm133_vm0, %v1015_v6  ;;  %v1128_v12 = vld [vmem:[%s1293_s2] sm:$0xff]   ;;  %v36_v15 = vld [vmem:[%s1291_s0 + $0x30] sm:$0xff] }
   0x5   :  { %911 = vmatpush3.bf16.msra.mxu0 %v135_v9  ;;  %927 = vmatpush3.bf16.msra.mxu1 %v1119_v10  ;;  %v1018_v13 = vld [vmem:[%s1292_s1 + $0x8] sm:$0xff]   ;;  %v1020_v16 = vld [vmem:[%s1292_s1] sm:$0xff]  }
   0x6   :  { %50 = vperm.xlu1 %1014, %v33_v3   ;;  %44 = vperm.xlu0 %1013, %v31_v4   ;;  %v1173_v43 = vld [vmem:[%s1294_s3] ss:$0 sm:$0xff] }
   0x7   :  { %912 = vmatprep.subr.bf16.mxu0 %v1016_v7  ;;  %928 = vmatprep.subr.bf16.mxu1 %v1042_v5 }
   0x9   :  { %913 = vmatpush3.bf16.msra.mxu0 %v1016_v7  ;;  %929 = vmatpush3.bf16.msra.mxu1 %v1128_v12 }
   0xa   :  { %56 = vperm.xlu1 %1014, %v35_v8   ;;  %53 = vperm.xlu0 %1013, %v34_v11  }
   0xb   :  { %914 = vmatprep.subr.bf16.mxu0 %v1018_v13  ;;  %934 = vmatprep.subr.bf16.mxu1 %v1042_v5 }
   0xc   :  { %931 = vmatmul.mubr.bf16.vlgmr.msra.gmra.mxu1 %v1041_v0 }
   0xd   :  { %915 = vmatpush3.bf16.msra.mxu0 %v1018_v13  ;;  %935 = vmatpush3.bf16.msra.mxu1 %v1119_v10 }
   0xe   :  { %62 = vperm.xlu1 %1014, %v37_v14   ;;  %59 = vperm.xlu0 %1013, %v36_v15  }
   0xf   :  { %916 = vmatprep.subr.bf16.mxu0 %v1020_v16  ;;  %936 = vmatprep.subr.bf16.mxu1 %v1042_v5 }
  0x10   :  { %938 = vmatprep.mubr.msk.bf16.mxu1 %vm1043_vm1, %v1042_v5 }
  0x11   :  { %917 = vmatpush3.bf16.msra.mxu0 %v1020_v16  ;;  %937 = vmatpush3.bf16.msra.mxu1 %v1128_v12 }
  0x12   :  { %942 = vmatprep.subr.bf16.mxu1 %v1042_v5  ;;  %950 = vmatprep.subr.bf16.mxu0 %v1042_v5 }
  0x7d   :  { %v48_v19 = vpop.permute.xlu1 %47  ;;  %v42_v20 = vpop.permute.xlu0 %41 }
  0x7e   :  { %vm66_vm2 = vcmp.eq.s32.totalorder %v48_v19, %v39_v18  ;;  %vm64_vm3 = vcmp.eq.s32.totalorder %v42_v20, %v39_v18 }
  0x7f   :  { %v840_v23 = vsel %vm66_vm2, 1.0, %v1042_v5  ;;  %v838_v24 = vsel %vm64_vm3, 1.0, %v1042_v5 }
  0x81   :  { %v51_v21 = vpop.permute.xlu1 %50  ;;  %v45_v22 = vpop.permute.xlu0 %44 }
  0x82   :  { %vm67_vm4 = vcmp.eq.s32.totalorder %v51_v21, %v39_v18  ;;  %vm65_vm5 = vcmp.eq.s32.totalorder %v45_v22, %v39_v18 }
  0x83   :  { %v841_v25 = vsel %vm67_vm4, 1.0, %v1042_v5  ;;  %v839_v26 = vsel %vm65_vm5, 1.0, %v1042_v5 }
  0x84   :  { %v89_v27 = vpack.c.bf16 %v841_v25, %v840_v23  ;;  %v88_v28 = vpack.c.bf16 %v839_v26, %v838_v24 }
  0x85   :  { %v57_v29 = vpop.permute.xlu1 %56  ;;  %v54_v30 = vpop.permute.xlu0 %53 }
  0x86   :  { %vm69_vm7 = vcmp.eq.s32.totalorder %v57_v29, %v39_v18  ;;  %vm68_vm8 = vcmp.eq.s32.totalorder %v54_v30, %v39_v18  ;;  %918 = vmatprep.mubr.msk.bf16.mxu0 %vm120_vm6, %v88_v28 }
  0x87   :  { %v843_v31 = vsel %vm69_vm7, 1.0, %v1042_v5  ;;  %v842_v32 = vsel %vm68_vm8, 1.0, %v1042_v5  ;;  %919 = vmatmul.mubr.msk.bf16.vlgmr.msra.gmra.mxu0 %vm120_vm6, %v89_v27 }
  0x88   :  { %v90_v33 = vpack.c.bf16 %v843_v31, %v842_v32  ;;  %951 = vmatpush3.bf16.msra.mxu0 %v1119_v10 }
  0x89   :  { %v63_v34 = vpop.permute.xlu1 %62  ;;  %v60_v35 = vpop.permute.xlu0 %59  ;;  %952 = vmatprep.subr.bf16.mxu0 %v1042_v5 }
  0x8a   :  { %vm71_vm9 = vcmp.eq.s32.totalorder %v63_v34, %v39_v18  ;;  %vm70_vm10 = vcmp.eq.s32.totalorder %v60_v35, %v39_v18  ;;  %922 = vmatprep.mubr.msk.bf16.mxu0 %vm120_vm6, %v90_v33 }
  0x8b   :  { %v845_v36 = vsel %vm71_vm9, 1.0, %v1042_v5  ;;  %v844_v37 = vsel %vm70_vm10, 1.0, %v1042_v5 }
  0x8c   :  { %v91_v38 = vpack.c.bf16 %v845_v36, %v844_v37  ;;  %953 = vmatpush3.bf16.msra.mxu0 %v1128_v12 }
  0x8d   :  { %966 = vmatprep.subr.bf16.mxu0 %v1042_v5 }
  0x8f   :  { %923 = vmatmul.mubr.msk.bf16.gmra.mxu0 %vm120_vm6, %v91_v38 }
  0x90   :  { %954 = vmatprep.mubr.msk.bf16.mxu0 %vm1043_vm1, %v1042_v5 }
  0xcc   :  { %v264_v39 = vpop.f32.mrf.mxu1 }
  0xce   :  { %v932_v40 = vpop.f32.mrf.mxu1 }
  0xd0   :  { %v267_v41 = vpop.f32.mrf.mxu1 }
  0xd2   :  { %v933_v42 = vpop.f32.mrf.mxu1 }
 0x147   :  { %v920_v44 = vpop.f32.mrf.mxu0 }
 0x148   :  { %641 = vrot.lane.b32.xlu1 %v920_v44, %s1044_s10  ;;  %618 = vrot.lane.b32.xlu0 %v920_v44, %s1045_s11  ;;  %v319_v45 = vadd.f32 %v920_v44, %v1173_v43 }
 0x149   :  { %v171_v46 = vpop.f32.mrf.mxu0 }
 0x14a   :  { %v213_v47 = vadd.f32 %v1173_v43, %v171_v46 }
 0x14b   :  { %v921_v48 = vpop.f32.mrf.mxu0 }
 0x14c   :  { %v270_v49 = vadd.f32 %v264_v39, %v213_v47  ;;  %664 = vrot.lane.b32.xlu0 %v920_v44, %s1046_s12  ;;  %620 = vrot.lane.b32.xlu1 %v921_v48, %s1045_s11  ;;  %v1182_v50 = vadd.f32 %v921_v48, %v1173_v43 }
 0x14d   :  { %v174_v51 = vpop.f32.mrf.mxu0 }
 0x14e   :  { %1025 = vtanh.f32 %v270_v49  ;;  %v272_v52 = vadd.f32 %v1173_v43, %v174_v51 }
 0x14f   :  { %v924_v53 = vpop.f32.mrf.mxu0 }
 0x150   :  { %614 = vrot.lane.b32.xlu0 %v171_v46, %s1045_s11  ;;  %666 = vrot.lane.b32.xlu1 %v921_v48, %s1046_s12  ;;  %v1188_v54 = vadd.f32 %v924_v53, %v1173_v43 }
 0x151   :  { %v187_v55 = vpop.f32.mrf.mxu0 }
 0x152   :  { %v1191_v56 = vadd.f32 %v1173_v43, %v187_v55 }
 0x153   :  { %v925_v57 = vpop.f32.mrf.mxu0 }
 0x154   :  { %v1194_v58 = vadd.f32 %v925_v57, %v1173_v43  ;;  %643 = vrot.lane.b32.xlu0 %v921_v48, %s1044_s10  ;;  %616 = vrot.lane.b32.xlu1 %v174_v51, %s1045_s11 }
 0x155   :  { %v1203_v61 = vpop.f32.mrf.mxu0 }
 0x158   :  { %639 = vrot.lane.b32.xlu0 %v174_v51, %s1044_s10  ;;  %649 = vrot.lane.b32.xlu1 %v924_v53, %s1044_s10 }
 0x15b   :  { %v1026_v59 = vpop.eup %1025 }
 0x15c   :  { %v273_v60 = vpack.c.bf16 %v1026_v59, %v1026_v59  ;;  %672 = vrot.lane.b32.xlu0 %v924_v53, %s1046_s12  ;;  %645 = vrot.lane.b32.xlu1 %v187_v55, %s1044_s10 }
 0x15e   :  { %939 = vmatmul.mubr.msk.bf16.vlgmr.msra.gmra.mxu1 %vm226_vm11, %v273_v60 }
 0x15f   :  { %943 = vmatpush3.bf16.msra.mxu1 %v1119_v10  ;;  %946 = vmatprep.mubr.msk.bf16.mxu1 %vm1043_vm1, %v1042_v5 }
 0x160   :  { %622 = vrot.lane.b32.xlu0 %v187_v55, %s1045_s11  ;;  %624 = vrot.lane.b32.xlu1 %v1203_v61, %s1045_s11 }
 0x161   :  { %944 = vmatprep.subr.bf16.mxu1 %v1042_v5 }
 0x163   :  { %945 = vmatpush3.bf16.msra.mxu1 %v1128_v12 }
 0x164   :  { %647 = vrot.lane.b32.xlu0 %v1203_v61, %s1044_s10  ;;  %674 = vrot.lane.b32.xlu1 %v925_v57, %s1046_s12 }
 0x165   :  { %958 = vmatprep.subr.bf16.mxu1 %v1042_v5 }
 0x168   :  { %668 = vrot.lane.b32.xlu0 %v187_v55, %s1046_s12  ;;  %670 = vrot.lane.b32.xlu1 %v1203_v61, %s1046_s12 }
 0x1ba   :  { %v619_v29 = vpop.permute.xlu0 %618  ;;  %v642_v30 = vpop.permute.xlu1 %641 }
 0x1be   :  { %v665_v31 = vpop.permute.xlu0 %664  ;;  %v621_v32 = vpop.permute.xlu1 %620 }
 0x1c2   :  { %v615_v33 = vpop.permute.xlu0 %614  ;;  %v667_v34 = vpop.permute.xlu1 %666 }
 0x1c6   :  { %v644_v35 = vpop.permute.xlu0 %643  ;;  %v617_v36 = vpop.permute.xlu1 %616 }
 0x1ca   :  { %v640_v37 = vpop.permute.xlu0 %639  ;;  %v650_v38 = vpop.permute.xlu1 %649 }
 0x1ce   :  { %v646_v39 = vpop.permute.xlu1 %645 }
 0x1d2   :  { %v625_v41 = vpop.permute.xlu1 %624 }
 0x1d6   :  { %v675_v46 = vpop.permute.xlu1 %674 }
 0x21e   :  { %v311_v62 = vpop.f32.mrf.mxu1 }
 0x21f   :  { %v317_v63 = vadd.f32 %v311_v62, %v272_v52 }
 0x220   :  { %v940_v0 = vpop.f32.mrf.mxu1 }
 0x221   :  { %1027 = vtanh.f32 %v317_v63  ;;  %v671_v63 = vpop.permute.xlu1 %670 }
 0x222   :  { %v314_v1 = vpop.f32.mrf.mxu1 }
 0x224   :  { %v941_v2 = vpop.f32.mrf.mxu1 }
 0x22e   :  { %v1028_v3 = vpop.eup %1027 }
 0x22f   :  { %v320_v4 = vpack.c.bf16 %v1028_v3, %v1028_v3 }
 0x231   :  { %947 = vmatmul.mubr.msk.bf16.vlgmr.msra.gmra.mxu1 %vm226_vm11, %v320_v4 }
 0x232   :  { %959 = vmatpush3.bf16.msra.mxu1 %v1119_v10  ;;  %962 = vmatprep.mubr.msk.bf16.mxu1 %vm1043_vm1, %v1042_v5 }
 0x233   :  { %960 = vmatprep.subr.bf16.mxu1 %v1042_v5 }
 0x236   :  { %961 = vmatpush3.bf16.msra.mxu1 %v1128_v12 }
 0x237   :  { %974 = vmatprep.subr.bf16.mxu1 %v1042_v5 }
 0x2f1   :  { %v358_v6 = vpop.f32.mrf.mxu1 }
 0x2f2   :  { %v364_v7 = vadd.f32 %v358_v6, %v319_v45 }
 0x2f3   :  { %v948_v8 = vpop.f32.mrf.mxu1 }
 0x2f4   :  { %1029 = vtanh.f32 %v364_v7 }
 0x2f5   :  { %v361_v9 = vpop.f32.mrf.mxu1 }
 0x2f7   :  { %v949_v11 = vpop.f32.mrf.mxu1 }
 0x301   :  { %v1030_v13 = vpop.eup %1029 }
 0x302   :  { %v367_v14 = vpack.c.bf16 %v1030_v13, %v1030_v13 }
 0x304   :  { %955 = vmatmul.mubr.msk.bf16.vlgmr.msra.gmra.mxu0 %vm226_vm11, %v367_v14 }
 0x305   :  { %967 = vmatpush3.bf16.msra.mxu0 %v1119_v10  ;;  %970 = vmatprep.mubr.msk.bf16.mxu0 %vm1043_vm1, %v1042_v5 }
 0x306   :  { %968 = vmatprep.subr.bf16.mxu0 %v1042_v5 }
 0x309   :  { %969 = vmatpush3.bf16.msra.mxu0 %v1128_v12 }
 0x30a   :  { %982 = vmatprep.subr.bf16.mxu0 %v1042_v5 }
 0x3c4   :  { %v405_v15 = vpop.f32.mrf.mxu0 }
 0x3c5   :  { %v411_v16 = vadd.f32 %v405_v15, %v1182_v50  ;;  %v460_v50 = vadd.f32 %v1173_v43, %v1203_v61 }
 0x3c6   :  { %v956_v17 = vpop.f32.mrf.mxu0 }
 0x3c7   :  { %1031 = vtanh.f32 %v411_v16 }
 0x3c8   :  { %v408_v18 = vpop.f32.mrf.mxu0 }
 0x3ca   :  { %v957_v19 = vpop.f32.mrf.mxu0 }
 0x3d4   :  { %v1032_v20 = vpop.eup %1031 }
 0x3d5   :  { %v414_v21 = vpack.c.bf16 %v1032_v20, %v1032_v20 }
 0x3d7   :  { %963 = vmatmul.mubr.msk.bf16.vlgmr.msra.gmra.mxu1 %vm226_vm11, %v414_v21 }
 0x3d8   :  { %975 = vmatpush3.bf16.msra.mxu1 %v1119_v10  ;;  %978 = vmatprep.mubr.msk.bf16.mxu1 %vm1043_vm1, %v1042_v5 }
 0x3d9   :  { %976 = vmatprep.subr.bf16.mxu1 %v1042_v5 }
 0x3dc   :  { %977 = vmatpush3.bf16.msra.mxu1 %v1128_v12 }
 0x3dd   :  { %990 = vmatprep.subr.bf16.mxu1 %v1042_v5 }
 0x497   :  { %v452_v22 = vpop.f32.mrf.mxu1 }
 0x498   :  { %v458_v23 = vadd.f32 %v452_v22, %v1191_v56 }
 0x499   :  { %v964_v24 = vpop.f32.mrf.mxu1 }
 0x49a   :  { %1033 = vtanh.f32 %v458_v23 }
 0x49b   :  { %v455_v25 = vpop.f32.mrf.mxu1 }
 0x49d   :  { %v965_v26 = vpop.f32.mrf.mxu1 }
 0x49e   :  { %v1021_v26 = vld [vmem:[%s1295_s6 + $0x8] sm:$0xff]  }
 0x4a7   :  { %v1034_v27 = vpop.eup %1033 }
 0x4a8   :  { %v461_v28 = vpack.c.bf16 %v1034_v27, %v1034_v27 }
 0x4aa   :  { %971 = vmatmul.mubr.msk.bf16.vlgmr.msra.gmra.mxu0 %vm226_vm11, %v461_v28 }
 0x4ab   :  { %983 = vmatpush3.bf16.msra.mxu0 %v1119_v10  ;;  %986 = vmatprep.mubr.msk.bf16.mxu0 %vm1043_vm1, %v1042_v5  ;;  %v673_v10 = vpop.permute.xlu0 %672 }
 0x4ac   :  { %984 = vmatprep.subr.bf16.mxu0 %v1042_v5 }
 0x4af   :  { %985 = vmatpush3.bf16.msra.mxu0 %v1128_v12  ;;  %v623_v40 = vpop.permute.xlu0 %622  ;;  %v864_v12 = vld [vmem:[%s1296_s4] ss:$0 sm:$0xff] }
 0x4b0   :  { %998 = vmatprep.subr.bf16.mxu0 %v1042_v5  ;;  %v637_v44 = vadd.f32 %v864_v12, %v625_v41  ;;  %v636_v45 = vadd.f32 %v864_v12, %v623_v40  ;;  %v632_v47 = vadd.f32 %v864_v12, %v615_v33  ;;  %v633_v48 = vadd.f32 %v864_v12, %v617_v36 }
 0x4b1   :  { %v634_v56 = vadd.f32 %v864_v12, %v619_v29  ;;  %v635_v57 = vadd.f32 %v864_v12, %v621_v32 }
 0x4b2   :  { %v657_v51 = vadd.f32 %v640_v37, %v632_v47  ;;  %v662_v52 = vadd.f32 %v650_v38, %v637_v44  ;;  %v658_v59 = vadd.f32 %v642_v30, %v633_v48  ;;  %v1022_v30 = vld [vmem:[%s1295_s6] sm:$0xff]  }
 0x4b3   :  { %v648_v42 = vpop.permute.xlu0 %647  ;;  %v659_v1 = vadd.f32 %v644_v35, %v634_v56  ;;  %v660_v3 = vadd.f32 %v646_v39, %v635_v57 }
 0x4b4   :  { %v661_v49 = vadd.f32 %v648_v42, %v636_v45  ;;  %v682_v2 = vadd.f32 %v665_v31, %v657_v51  ;;  %v687_v4 = vadd.f32 %v675_v46, %v662_v52  ;;  %v683_v7 = vadd.f32 %v667_v34, %v658_v59  ;;  %v1023_v42 = vld [vmem:[%s1297_s5 + $0x8] sm:$0xff]  }
 0x4b5   :  { %v685_v43 = vadd.f32 %v671_v63, %v660_v3 }
 0x4b6   :  { %v686_v60 = vadd.f32 %v673_v10, %v661_v49  ;;  %v688_v11 = vmax.f32 %v682_v2, 0.0  ;;  %v693_v13 = vmax.f32 %v687_v4, 0.0  ;;  %v689_v14 = vmax.f32 %v683_v7, 0.0 }
 0x4b7   :  { %v669_v0 = vpop.permute.xlu0 %668  ;;  %v691_v16 = vmax.f32 %v685_v43, 0.0 }
 0x4b8   :  { %v692_v8 = vmax.f32 %v686_v60, 0.0  ;;  %v684_v61 = vadd.f32 %v669_v0, %v659_v1  ;;  %v694_v18 = vsel %vm226_vm11, %v688_v11, -inf  ;;  %v700_v19 = vsel %vm226_vm11, %v693_v13, -inf }
 0x4b9   :  { %v695_v21 = vsel %vm226_vm11, %v689_v14, -inf  ;;  %v697_v22 = vsel %vm226_vm11, %v691_v16, -inf }
 0x4ba   :  { %v698_v15 = vsel %vm226_vm11, %v692_v8, -inf  ;;  %v690_v17 = vmax.f32 %v684_v61, 0.0  ;;  %v701_v24 = vmax.f32 %v695_v21, %v700_v19 }
 0x4bb   :  { %v699_v20 = vmax.f32 %v694_v18, %v698_v15 }
 0x4bc   :  { %v696_v23 = vsel %vm226_vm11, %v690_v17, -inf }
 0x4bd   :  { %v702_v27 = vmax.f32 %v699_v20, %v701_v24  ;;  %v703_v28 = vmax.f32 %v696_v23, %v697_v22 }
 0x4bf   :  { %v704_v31 = vmax.f32 %v702_v27, %v703_v28 }
 0x4c1   :  { %v710_v32 = vpack.c.bf16 %v704_v31, %v704_v31 }
 0x56a   :  { %v499_v53 = vpop.f32.mrf.mxu0 }
 0x56b   :  { %v505_v55 = vadd.f32 %v499_v53, %v460_v50 }
 0x56c   :  { %v972_v62 = vpop.f32.mrf.mxu0 }
 0x56d   :  { %1035 = vtanh.f32 %v505_v55 }
 0x56e   :  { %v502_v6 = vpop.f32.mrf.mxu0 }
 0x570   :  { %v973_v9 = vpop.f32.mrf.mxu0 }
 0x57a   :  { %v1036_v25 = vpop.eup %1035 }
 0x57b   :  { %v508_v29 = vpack.c.bf16 %v1036_v25, %v1036_v25 }
 0x57d   :  { %979 = vmatmul.mubr.msk.bf16.vlgmr.msra.gmra.mxu1 %vm226_vm11, %v508_v29 }
 0x57e   :  { %991 = vmatpush3.bf16.msra.mxu1 %v1021_v26  ;;  %994 = vmatprep.mubr.msk.bf16.mxu1 %vm1043_vm1, %v1042_v5 }
 0x57f   :  { %992 = vmatprep.subr.bf16.mxu1 %v1042_v5 }
 0x582   :  { %993 = vmatpush3.bf16.msra.mxu1 %v1022_v30 }
 0x585   :  { %995 = vmatmul.mubr.msk.bf16.vlgmr.msra.gmra.mxu1 %vm226_vm11, %v710_v32 }
 0x63d   :  { %v546_v33 = vpop.f32.mrf.mxu1 }
 0x63e   :  { %v552_v34 = vadd.f32 %v546_v33, %v1188_v54  ;;  %v1024_v54 = vld [vmem:[%s1297_s5] sm:$0xff]  }
 0x63f   :  { %v980_v35 = vpop.f32.mrf.mxu1 }
 0x640   :  { %1037 = vtanh.f32 %v552_v34 }
 0x641   :  { %v549_v36 = vpop.f32.mrf.mxu1 }
 0x643   :  { %v981_v37 = vpop.f32.mrf.mxu1 }
 0x645   :  { %v764_v38 = vpop.f32.mrf.mxu1 }
 0x647   :  { %v996_v10 = vpop.f32.mrf.mxu1 }
 0x649   :  { %v767_v39 = vpop.f32.mrf.mxu1 }
 0x64b   :  { %v997_v40 = vpop.f32.mrf.mxu1 }
 0x64d   :  { %v1038_v41 = vpop.eup %1037 }
 0x64e   :  { %v555_v12 = vpack.c.bf16 %v1038_v41, %v1038_v41 }
 0x650   :  { %987 = vmatmul.mubr.msk.bf16.vlgmr.msra.gmra.mxu0 %vm226_vm11, %v555_v12 }
 0x651   :  { %1002 = vmatprep.mubr.msk.bf16.mxu0 %vm1043_vm1, %v1042_v5  ;;  %999 = vmatpush3.bf16.msra.mxu0 %v1023_v42 }
 0x652   :  { %1000 = vmatprep.subr.bf16.mxu0 %v1042_v5  ;;  %v871_v5 = vld [vmem:[%s1298_s7] ss:$0 sm:$0xff] }
 0x655   :  { %1001 = vmatpush3.bf16.msra.mxu0 %v1024_v54 }
 0x710   :  { %v593_v44 = vpop.f32.mrf.mxu0 }
 0x711   :  { %v599_v45 = vadd.f32 %v593_v44, %v1194_v58 }
 0x712   :  { %v988_v46 = vpop.f32.mrf.mxu0 }
 0x713   :  { %1039 = vtanh.f32 %v599_v45 }
 0x714   :  { %v596_v47 = vpop.f32.mrf.mxu0 }
 0x716   :  { %v989_v48 = vpop.f32.mrf.mxu0 }
 0x720   :  { %v1040_v49 = vpop.eup %1039 }
 0x721   :  { %v705_v50 = vpack.c.bf16 %v1040_v49, %v1040_v49 }
 0x723   :  { %1003 = vmatmul.mubr.msk.bf16.vlgmr.msra.gmra.mxu0 %vm226_vm11, %v705_v50 }
 0x7e3   :  { %v819_v51 = vpop.f32.mrf.mxu0 }
 0x7e4   :  { %v820_v52 = vadd.f32 %v819_v51, %v764_v38 }
 0x7e5   :  { %v1004_v53 = vpop.f32.mrf.mxu0 }
 0x7e6   :  { %v832_v55 = vadd.f32 %v871_v5, %v820_v52 }
 0x7e7   :  { %v822_v56 = vpop.f32.mrf.mxu0 }
 0x7e8   :  { %833 = vst [vmem:[%s1299_s8] sm:$0xff] %v832_v55 }
 0x7e9   :  { %v1005_v58 = vpop.f32.mrf.mxu0 }

</bundles_post_ra>
